<compile_context>
chip_gen: v7x
topology: tpu7x:2x2x1
jax: 0.10.0
libtpu: 0.0.40
codegen_flags: <defaults>
</compile_context>

<pallas_src>
import math

import jax
import jax.numpy as jnp
from jax.experimental import pallas as pl
from jax.experimental.pallas import tpu as pltpu

# ---- small, module-consistent hyper-parameters -------------------------------
INPUT_DIM = 2
HIDDEN_DIM = 32     # d_model
OUTPUT_DIM = 2
NUM_HEADS = 4
NUM_LAYERS = 2
FF_DIM = 64         # dim_feedforward
LN_EPS = 1e-5

BATCH = 2
SEQ = 8

VEC_W = max(3 * HIDDEN_DIM, FF_DIM)   # width of the packed bias/LN row slab (96)
NEG_INF = -1e30                        # cross-batch attention mask value


# ------------------------------ in-kernel helpers -----------------------------
def _layer_norm(v, w, b):
    mu = jnp.mean(v, axis=-1, keepdims=True)
    var = jnp.mean(jnp.square(v - mu), axis=-1, keepdims=True)
    return (v - mu) * jax.lax.rsqrt(var + LN_EPS) * w + b


# ------------------------------ fused forward kernel --------------------------
def _make_fused_kernel(B, S):
    H, NH, FF, L = HIDDEN_DIM, NUM_HEADS, FF_DIM, NUM_LAYERS
    DH = H // NH
    BS = B * S
    assert S & (S - 1) == 0, "SEQ must be a power of two for the shift-based batch mask"
    log2_s = S.bit_length() - 1

    def kernel(x_ref, emb_ref, wa_ref, w2_ref, vec_ref, fc_ref, o_ref):
        # ---- embedding: one (B*S, Din) @ (Din, H) matmul ----
        emb = emb_ref[...]                                            # (Din+1, H)
        h2d = (jnp.dot(x_ref[...], emb[:INPUT_DIM, :],
                       preferred_element_type=jnp.float32)
               + emb[INPUT_DIM:INPUT_DIM + 1, :])                     # (B*S, H)

        # Block-diagonal additive mask: token row r belongs to batch r >> log2(S); masking
        # cross-batch score entries to -1e30 lets every batch element share one attention
        # matmul per head (exp underflows to 0, so the softmax is exactly per-batch).
        ri = jnp.right_shift(jax.lax.broadcasted_iota(jnp.int32, (BS, BS), 0), log2_s)
        ci = jnp.right_shift(jax.lax.broadcasted_iota(jnp.int32, (BS, BS), 1), log2_s)
        batch_bias = jnp.where(ri == ci, 0.0, NEG_INF)                # (B*S, B*S) f32

        # TODO(synk): dropout layers omitted (eval-mode identity).
        def layer(l, h):
            wa = wa_ref[l]                      # (H, 3H | H | FF) packed weight slab
            w2 = w2_ref[l]                      # (FF, H)
            vec = vec_ref[l]                    # (8, VEC_W) packed bias/LN rows
            wqkv = wa[:, :3 * H]                # in_proj (q-third pre-scaled by 1/sqrt(DH))
            wo = wa[:, 3 * H:4 * H]             # out_proj
            w1 = wa[:, 4 * H:4 * H + FF]        # linear1
            bqkv = vec[0:1, :3 * H]
            b1 = vec[1:2, :FF]
            bo = vec[2:3, :H]
            ln1w, ln1b = vec[3:4, :H], vec[4:5, :H]
            ln2w, ln2b = vec[5:6, :H], vec[6:7, :H]
            b2 = vec[7:8, :H]

            # ---- fused QKV projection: single lane-dense (B*S,H)@(H,3H) matmul ----
            qkv = jnp.dot(h, wqkv, preferred_element_type=jnp.float32) + bqkv   # (B*S, 3H)

            # ---- multi-head self-attention; batch handled by the block-diagonal mask ----
            ctx_heads = []
            for hd in range(NH):                # static head loop, lane slices only
                qh = qkv[:, hd * DH:(hd + 1) * DH]                    # (B*S, DH)
                kh = qkv[:, H + hd * DH:H + (hd + 1) * DH]
                vh = qkv[:, 2 * H + hd * DH:2 * H + (hd + 1) * DH]
                s = jnp.dot(qh, kh.T, preferred_element_type=jnp.float32) + batch_bias
                s = s - jnp.max(s, axis=-1, keepdims=True)
                p = jnp.exp(s)
                p = p / jnp.sum(p, axis=-1, keepdims=True)            # exact divide
                ctx_heads.append(jnp.dot(p, vh, preferred_element_type=jnp.float32))
            ctx2d = jnp.concatenate(ctx_heads, axis=1)                # (B*S, H)

            # ---- out-projection: one (B*S,H)@(H,H) matmul ----
            attn = jnp.dot(ctx2d, wo, preferred_element_type=jnp.float32) + bo

            # ---- post-norm residual 1 ----
            y = _layer_norm(h + attn, ln1w, ln1b)

            # ---- feed-forward on merged (B*S, H) ----
            ff = jnp.maximum(
                jnp.dot(y, w1, preferred_element_type=jnp.float32) + b1, 0.0)
            ff = jnp.dot(ff, w2, preferred_element_type=jnp.float32) + b2

            # ---- post-norm residual 2 ----
            return _layer_norm(y + ff, ln2w, ln2b)

        h2d = jax.lax.fori_loop(0, L, layer, h2d)

        # ---- epilogue: last token per batch element + fc ----
        last = jnp.concatenate(
            [h2d[b * S + S - 1:b * S + S, :] for b in range(B)], axis=0)   # (B, H)
        fc = fc_ref[...]                                                    # (H+1, OUT)
        out = (jnp.dot(last, fc[:H, :], preferred_element_type=jnp.float32)
               + fc[H:H + 1, :])
        o_ref[...] = out.astype(o_ref.dtype)

    return kernel


# ------------------------------ host-side param prep --------------------------
def _prep_kernel_params(params):
    """Packs canonical (PyTorch-layout, pre-transposed) params into a few lane-dense,
    per-layer-stacked slabs.  Pure one-time weight preprocessing (incl. folding 1/sqrt(DH)
    into the q third of the in-projection)."""
    H, FF = HIDDEN_DIM, FF_DIM
    DH = H // NUM_HEADS
    scale = 1.0 / math.sqrt(DH)

    def pad_w(v):
        return jnp.pad(v, ((0, 0), (0, VEC_W - v.shape[1])))

    emb_w, emb_b = params["embedding"]
    emb_wb = jnp.concatenate([emb_w, emb_b], axis=0)                  # (Din+1, H)

    wa_l, w2_l, vec_l = [], [], []
    for (wqkv, bqkv, wo, bo, ln1w, ln1b, ln2w, ln2b, w1, b1, w2, b2) in params["layers"]:
        # fold attention scale into the q columns (free preprocessing)
        wqkv_s = jnp.concatenate([wqkv[:, :H] * scale, wqkv[:, H:]], axis=1)
        bqkv_s = jnp.concatenate([bqkv[:, :H] * scale, bqkv[:, H:]], axis=1)
        wa_l.append(jnp.concatenate([wqkv_s, wo, w1], axis=1))        # (H, 3H + H + FF)
        w2_l.append(w2)                                               # (FF, H)
        vec_l.append(jnp.concatenate(
            [pad_w(bqkv_s),            # row 0: qkv bias (q-third pre-scaled)
             pad_w(b1),                # row 1: linear1 bias
             pad_w(bo),                # row 2: out_proj bias
             pad_w(ln1w), pad_w(ln1b), # rows 3,4
             pad_w(ln2w), pad_w(ln2b), # rows 5,6
             pad_w(b2)], axis=0))      # row 7: linear2 bias      -> (8, VEC_W)
    wa_all = jnp.stack(wa_l)      # (L, H, 3H+H+FF)
    w2_all = jnp.stack(w2_l)      # (L, FF, H)
    vec_all = jnp.stack(vec_l)    # (L, 8, VEC_W)

    fc_w, fc_b = params["fc"]
    fc_wb = jnp.concatenate([fc_w, fc_b], axis=0)                     # (H+1, OUT)
    return [emb_wb, wa_all, w2_all, vec_all, fc_wb]


# ------------------------------ pallas_call wrapper ----------------------------
def transformer_forward(x, params):
    B, S, Din = x.shape
    x2d = x.reshape(B * S, Din)
    args = [x2d] + _prep_kernel_params(params)   # 6 input refs total

    def full_spec(a):
        nd = a.ndim
        return pl.BlockSpec(a.shape, lambda i, _nd=nd: (0,) * _nd)

    return pl.pallas_call(
        _make_fused_kernel(B, S),
        out_shape=jax.ShapeDtypeStruct((B, OUTPUT_DIM), jnp.float32),
        grid=(1,),
        in_specs=[full_spec(a) for a in args],
        out_specs=pl.BlockSpec((B, OUTPUT_DIM), lambda i: (0, 0)),
        compiler_params=pltpu.CompilerParams(dimension_semantics=("arbitrary",)),
    )(*args)


# ------------------------------ parameter init --------------------------------
def init_params(key):
    def dense(k, shape, scale=0.05):
        return jax.random.normal(k, shape, jnp.float32) * scale

    keys = iter(jax.random.split(key, 4 + 8 * NUM_LAYERS))
    params = {}
    # embedding: Linear(INPUT_DIM -> HIDDEN_DIM), stored pre-transposed (K, N)
    params["embedding"] = (
        dense(next(keys), (INPUT_DIM, HIDDEN_DIM)),
        dense(next(keys), (1, HIDDEN_DIM)),
    )
    layers = []
    for _ in range(NUM_LAYERS):
        wqkv = dense(next(keys), (HIDDEN_DIM, 3 * HIDDEN_DIM))   # in_proj (transposed)
        bqkv = dense(next(keys), (1, 3 * HIDDEN_DIM))
        wo = dense(next(keys), (HIDDEN_DIM, HIDDEN_DIM))         # out_proj (transposed)
        bo = dense(next(keys), (1, HIDDEN_DIM))
        ln1w = jnp.ones((1, HIDDEN_DIM), jnp.float32)
        ln1b = jnp.zeros((1, HIDDEN_DIM), jnp.float32)
        ln2w = jnp.ones((1, HIDDEN_DIM), jnp.float32)
        ln2b = jnp.zeros((1, HIDDEN_DIM), jnp.float32)
        w1 = dense(next(keys), (HIDDEN_DIM, FF_DIM))             # linear1 (transposed)
        b1 = dense(next(keys), (1, FF_DIM))
        w2 = dense(next(keys), (FF_DIM, HIDDEN_DIM))             # linear2 (transposed)
        b2 = dense(next(keys), (1, HIDDEN_DIM))
        layers.append((wqkv, bqkv, wo, bo, ln1w, ln1b, ln2w, ln2b, w1, b1, w2, b2))
    params["layers"] = layers
    # fc: Linear(HIDDEN_DIM -> OUTPUT_DIM)
    params["fc"] = (
        dense(next(keys), (HIDDEN_DIM, OUTPUT_DIM)),
        dense(next(keys), (1, OUTPUT_DIM)),
    )
    return params


# ------------------------------ pure-JAX reference -----------------------------
def reference_forward(x, params):
    def ln(v, w, b):
        mu = jnp.mean(v, axis=-1, keepdims=True)
        var = jnp.mean(jnp.square(v - mu), axis=-1, keepdims=True)
        return (v - mu) * jax.lax.rsqrt(var + LN_EPS) * w + b

    emb_wt, emb_b = params["embedding"]
    h = x @ emb_wt + emb_b
    for (wqkv, bqkv, wo, bo, ln1w, ln1b, ln2w, ln2b, w1, b1, w2, b2) in params["layers"]:
        B, S, H = h.shape
        dh = H // NUM_HEADS
        qkv = h @ wqkv + bqkv
        q = qkv[..., :H].reshape(B, S, NUM_HEADS, dh)
        k = qkv[..., H:2 * H].reshape(B, S, NUM_HEADS, dh)
        v = qkv[..., 2 * H:].reshape(B, S, NUM_HEADS, dh)
        s = jnp.einsum("bqhd,bkhd->bhqk", q, k) / math.sqrt(dh)
        p = jax.nn.softmax(s, axis=-1)
        a = jnp.einsum("bhqk,bkhd->bqhd", p, v).reshape(B, S, H)
        a = a @ wo + bo
        y = ln(h + a, ln1w, ln1b)
        f = jnp.maximum(y @ w1 + b1, 0.0) @ w2 + b2
        h = ln(y + f, ln2w, ln2b)
    fc_wt, fc_b = params["fc"]
    return h[:, -1, :] @ fc_wt + fc_b


if __name__ == "__main__":
    key = jax.random.PRNGKey(0)
    k_x, k_p = jax.random.split(key)
    x = jax.random.normal(k_x, (BATCH, SEQ, INPUT_DIM), jnp.float32)
    params = init_params(k_p)

    out = transformer_forward(x, params)
    out = jax.block_until_ready(out)

    ref = reference_forward(x, params)
    assert out.shape == (BATCH, OUTPUT_DIM)
    assert jnp.allclose(out, ref, rtol=1e-3, atol=1e-4), (out, ref)

    print("KERNEL_OK")
</pallas_src>

<mosaic_0001>
module attributes {stable_mosaic.version = 11 : i64} {
  func.func @kernel(%arg0: i32, %arg1: memref<16x2xf32, #tpu.memory_space<vmem>>, %arg2: memref<3x32xf32, #tpu.memory_space<vmem>>, %arg3: memref<2x32x192xf32, #tpu.memory_space<vmem>>, %arg4: memref<2x64x32xf32, #tpu.memory_space<vmem>>, %arg5: memref<2x8x96xf32, #tpu.memory_space<vmem>>, %arg6: memref<33x2xf32, #tpu.memory_space<vmem>>, %arg7: memref<2x2xf32, #tpu.memory_space<vmem>>) attributes {dimension_semantics = [#tpu.dimension_semantics<arbitrary>], iteration_bounds = array<i64: 1>, scalar_prefetch = 0 : i64, scratch_operands = 0 : i64, tpu.core_type = #tpu.core_type<tc>, window_params = [{pipeline_mode = #tpu.pipeline_mode<synchronous>, transform_indices = @transform_0, window_bounds = array<i64: 16, 2>}, {pipeline_mode = #tpu.pipeline_mode<synchronous>, transform_indices = @transform_1, window_bounds = array<i64: 3, 32>}, {pipeline_mode = #tpu.pipeline_mode<synchronous>, transform_indices = @transform_2, window_bounds = array<i64: 2, 32, 192>}, {pipeline_mode = #tpu.pipeline_mode<synchronous>, transform_indices = @transform_3, window_bounds = array<i64: 2, 64, 32>}, {pipeline_mode = #tpu.pipeline_mode<synchronous>, transform_indices = @transform_4, window_bounds = array<i64: 2, 8, 96>}, {pipeline_mode = #tpu.pipeline_mode<synchronous>, transform_indices = @transform_5, window_bounds = array<i64: 33, 2>}, {pipeline_mode = #tpu.pipeline_mode<synchronous>, transform_indices = @transform_6, window_bounds = array<i64: 2, 2>}]} {
    %c0 = arith.constant 0 : index
    %c0_0 = arith.constant 0 : index
    %0 = vector.load %arg2[%c0, %c0_0] : memref<3x32xf32, #tpu.memory_space<vmem>>, vector<3x32xf32>
    %c0_1 = arith.constant 0 : index
    %c0_2 = arith.constant 0 : index
    %1 = vector.load %arg1[%c0_1, %c0_2] : memref<16x2xf32, #tpu.memory_space<vmem>>, vector<16x2xf32>
    %2 = vector.extract_strided_slice %0 {offsets = [0, 0], sizes = [2, 32], strides = [1, 1]} : vector<3x32xf32> to vector<2x32xf32>
    %cst = arith.constant dense<0.000000e+00> : vector<16x32xf32>
    %3 = tpu.matmul %1, %2, %cst {dimension_numbers = #tpu.dot_dimension_numbers<[1], [0], [0], [1], [0, 0, 1, 1], [], []>} : vector<16x2xf32>, vector<2x32xf32>, vector<16x32xf32> -> vector<16x32xf32>
    %4 = vector.extract_strided_slice %0 {offsets = [2, 0], sizes = [1, 32], strides = [1, 1]} : vector<3x32xf32> to vector<1x32xf32>
    %5 = vector.broadcast %4 : vector<1x32xf32> to vector<16x32xf32>
    %6 = arith.addf %3, %5 : vector<16x32xf32>
    %7 = tpu.iota {dimensions = array<i32: 0>} : vector<16x16xi32>
    %c3_i32 = arith.constant 3 : i32
    %8 = vector.broadcast %c3_i32 : i32 to vector<16x16xi32>
    %9 = arith.shrsi %7, %8 : vector<16x16xi32>
    %10 = tpu.iota {dimensions = array<i32: 1>} : vector<16x16xi32>
    %c3_i32_3 = arith.constant 3 : i32
    %11 = vector.broadcast %c3_i32_3 : i32 to vector<16x16xi32>
    %12 = arith.shrsi %10, %11 : vector<16x16xi32>
    %13 = arith.cmpi eq, %9, %12 : vector<16x16xi32>
    %cst_4 = arith.constant 0.000000e+00 : f32
    %cst_5 = arith.constant -1.000000e+30 : f32
    %14 = vector.broadcast %cst_4 : f32 to vector<16x16xf32>
    %15 = vector.broadcast %cst_5 : f32 to vector<16x16xf32>
    %16 = arith.select %13, %14, %15 : vector<16x16xi1>, vector<16x16xf32>
    %c0_i32 = arith.constant 0 : i32
    %c2_i32 = arith.constant 2 : i32
    %17 = arith.addi %c0_i32, %c2_i32 : i32
    %c1_i32 = arith.constant 1 : i32
    %18 = scf.for %arg8 = %c0_i32 to %17 step %c1_i32 iter_args(%arg9 = %6) -> (vector<16x32xf32>)  : i32 {
      %29 = arith.index_cast %arg8 : i32 to index
      %c0_12 = arith.constant 0 : index
      %c0_13 = arith.constant 0 : index
      %30 = vector.load %arg3[%29, %c0_12, %c0_13] : memref<2x32x192xf32, #tpu.memory_space<vmem>>, vector<1x32x192xf32>
      %31 = vector.shape_cast %30 : vector<1x32x192xf32> to vector<32x192xf32>
      %32 = arith.index_cast %arg8 : i32 to index
      %c0_14 = arith.constant 0 : index
      %c0_15 = arith.constant 0 : index
      %33 = vector.load %arg4[%32, %c0_14, %c0_15] : memref<2x64x32xf32, #tpu.memory_space<vmem>>, vector<1x64x32xf32>
      %34 = vector.shape_cast %33 : vector<1x64x32xf32> to vector<64x32xf32>
      %35 = arith.index_cast %arg8 : i32 to index
      %c0_16 = arith.constant 0 : index
      %c0_17 = arith.constant 0 : index
      %36 = vector.load %arg5[%35, %c0_16, %c0_17] : memref<2x8x96xf32, #tpu.memory_space<vmem>>, vector<1x8x96xf32>
      %37 = vector.shape_cast %36 : vector<1x8x96xf32> to vector<8x96xf32>
      %38 = vector.extract_strided_slice %31 {offsets = [0, 0], sizes = [32, 96], strides = [1, 1]} : vector<32x192xf32> to vector<32x96xf32>
      %39 = vector.extract_strided_slice %31 {offsets = [0, 96], sizes = [32, 32], strides = [1, 1]} : vector<32x192xf32> to vector<32x32xf32>
      %40 = vector.extract_strided_slice %31 {offsets = [0, 128], sizes = [32, 64], strides = [1, 1]} : vector<32x192xf32> to vector<32x64xf32>
      %41 = vector.extract_strided_slice %37 {offsets = [0, 0], sizes = [1, 96], strides = [1, 1]} : vector<8x96xf32> to vector<1x96xf32>
      %42 = vector.extract_strided_slice %37 {offsets = [1, 0], sizes = [1, 64], strides = [1, 1]} : vector<8x96xf32> to vector<1x64xf32>
      %43 = vector.extract_strided_slice %37 {offsets = [2, 0], sizes = [1, 32], strides = [1, 1]} : vector<8x96xf32> to vector<1x32xf32>
      %44 = vector.extract_strided_slice %37 {offsets = [3, 0], sizes = [1, 32], strides = [1, 1]} : vector<8x96xf32> to vector<1x32xf32>
      %45 = vector.extract_strided_slice %37 {offsets = [4, 0], sizes = [1, 32], strides = [1, 1]} : vector<8x96xf32> to vector<1x32xf32>
      %46 = vector.extract_strided_slice %37 {offsets = [5, 0], sizes = [1, 32], strides = [1, 1]} : vector<8x96xf32> to vector<1x32xf32>
      %47 = vector.extract_strided_slice %37 {offsets = [6, 0], sizes = [1, 32], strides = [1, 1]} : vector<8x96xf32> to vector<1x32xf32>
      %48 = vector.extract_strided_slice %37 {offsets = [7, 0], sizes = [1, 32], strides = [1, 1]} : vector<8x96xf32> to vector<1x32xf32>
      %cst_18 = arith.constant dense<0.000000e+00> : vector<16x96xf32>
      %49 = tpu.matmul %arg9, %38, %cst_18 {dimension_numbers = #tpu.dot_dimension_numbers<[1], [0], [0], [1], [0, 0, 1, 1], [], []>} : vector<16x32xf32>, vector<32x96xf32>, vector<16x96xf32> -> vector<16x96xf32>
      %50 = vector.broadcast %41 : vector<1x96xf32> to vector<16x96xf32>
      %51 = arith.addf %49, %50 : vector<16x96xf32>
      %52 = vector.extract_strided_slice %51 {offsets = [0, 0], sizes = [16, 8], strides = [1, 1]} : vector<16x96xf32> to vector<16x8xf32>
      %53 = vector.extract_strided_slice %51 {offsets = [0, 32], sizes = [16, 8], strides = [1, 1]} : vector<16x96xf32> to vector<16x8xf32>
      %54 = vector.extract_strided_slice %51 {offsets = [0, 64], sizes = [16, 8], strides = [1, 1]} : vector<16x96xf32> to vector<16x8xf32>
      %55 = tpu.transpose %53, [1, 0] : vector<16x8xf32> -> vector<8x16xf32>
      %cst_19 = arith.constant dense<0.000000e+00> : vector<16x16xf32>
      %56 = tpu.matmul %52, %55, %cst_19 {dimension_numbers = #tpu.dot_dimension_numbers<[1], [0], [0], [1], [0, 0, 1, 1], [], []>} : vector<16x8xf32>, vector<8x16xf32>, vector<16x16xf32> -> vector<16x16xf32>
      %57 = arith.addf %56, %16 : vector<16x16xf32>
      %cst_20 = arith.constant dense<0xFF800000> : vector<16xf32>
      %58 = vector.multi_reduction <maximumf>, %57, %cst_20 [1] : vector<16x16xf32> to vector<16xf32>
      %59 = vector.shape_cast %58 : vector<16xf32> to vector<16x1xf32>
      %60 = vector.broadcast %59 : vector<16x1xf32> to vector<16x16xf32>
      %61 = arith.subf %57, %60 : vector<16x16xf32>
      %62 = math.exp %61 : vector<16x16xf32>
      %cst_21 = arith.constant dense<0.000000e+00> : vector<16xf32>
      %63 = vector.multi_reduction <add>, %62, %cst_21 [1] : vector<16x16xf32> to vector<16xf32>
      %64 = vector.shape_cast %63 : vector<16xf32> to vector<16x1xf32>
      %65 = vector.broadcast %64 : vector<16x1xf32> to vector<16x16xf32>
      %66 = arith.divf %62, %65 : vector<16x16xf32>
      %cst_22 = arith.constant dense<0.000000e+00> : vector<16x8xf32>
      %67 = tpu.matmul %66, %54, %cst_22 {dimension_numbers = #tpu.dot_dimension_numbers<[1], [0], [0], [1], [0, 0, 1, 1], [], []>} : vector<16x16xf32>, vector<16x8xf32>, vector<16x8xf32> -> vector<16x8xf32>
      %68 = vector.extract_strided_slice %51 {offsets = [0, 8], sizes = [16, 8], strides = [1, 1]} : vector<16x96xf32> to vector<16x8xf32>
      %69 = vector.extract_strided_slice %51 {offsets = [0, 40], sizes = [16, 8], strides = [1, 1]} : vector<16x96xf32> to vector<16x8xf32>
      %70 = vector.extract_strided_slice %51 {offsets = [0, 72], sizes = [16, 8], strides = [1, 1]} : vector<16x96xf32> to vector<16x8xf32>
      %71 = tpu.transpose %69, [1, 0] : vector<16x8xf32> -> vector<8x16xf32>
      %cst_23 = arith.constant dense<0.000000e+00> : vector<16x16xf32>
      %72 = tpu.matmul %68, %71, %cst_23 {dimension_numbers = #tpu.dot_dimension_numbers<[1], [0], [0], [1], [0, 0, 1, 1], [], []>} : vector<16x8xf32>, vector<8x16xf32>, vector<16x16xf32> -> vector<16x16xf32>
      %73 = arith.addf %72, %16 : vector<16x16xf32>
      %cst_24 = arith.constant dense<0xFF800000> : vector<16xf32>
      %74 = vector.multi_reduction <maximumf>, %73, %cst_24 [1] : vector<16x16xf32> to vector<16xf32>
      %75 = vector.shape_cast %74 : vector<16xf32> to vector<16x1xf32>
      %76 = vector.broadcast %75 : vector<16x1xf32> to vector<16x16xf32>
      %77 = arith.subf %73, %76 : vector<16x16xf32>
      %78 = math.exp %77 : vector<16x16xf32>
      %cst_25 = arith.constant dense<0.000000e+00> : vector<16xf32>
      %79 = vector.multi_reduction <add>, %78, %cst_25 [1] : vector<16x16xf32> to vector<16xf32>
      %80 = vector.shape_cast %79 : vector<16xf32> to vector<16x1xf32>
      %81 = vector.broadcast %80 : vector<16x1xf32> to vector<16x16xf32>
      %82 = arith.divf %78, %81 : vector<16x16xf32>
      %cst_26 = arith.constant dense<0.000000e+00> : vector<16x8xf32>
      %83 = tpu.matmul %82, %70, %cst_26 {dimension_numbers = #tpu.dot_dimension_numbers<[1], [0], [0], [1], [0, 0, 1, 1], [], []>} : vector<16x16xf32>, vector<16x8xf32>, vector<16x8xf32> -> vector<16x8xf32>
      %84 = vector.extract_strided_slice %51 {offsets = [0, 16], sizes = [16, 8], strides = [1, 1]} : vector<16x96xf32> to vector<16x8xf32>
      %85 = vector.extract_strided_slice %51 {offsets = [0, 48], sizes = [16, 8], strides = [1, 1]} : vector<16x96xf32> to vector<16x8xf32>
      %86 = vector.extract_strided_slice %51 {offsets = [0, 80], sizes = [16, 8], strides = [1, 1]} : vector<16x96xf32> to vector<16x8xf32>
      %87 = tpu.transpose %85, [1, 0] : vector<16x8xf32> -> vector<8x16xf32>
      %cst_27 = arith.constant dense<0.000000e+00> : vector<16x16xf32>
      %88 = tpu.matmul %84, %87, %cst_27 {dimension_numbers = #tpu.dot_dimension_numbers<[1], [0], [0], [1], [0, 0, 1, 1], [], []>} : vector<16x8xf32>, vector<8x16xf32>, vector<16x16xf32> -> vector<16x16xf32>
      %89 = arith.addf %88, %16 : vector<16x16xf32>
      %cst_28 = arith.constant dense<0xFF800000> : vector<16xf32>
      %90 = vector.multi_reduction <maximumf>, %89, %cst_28 [1] : vector<16x16xf32> to vector<16xf32>
      %91 = vector.shape_cast %90 : vector<16xf32> to vector<16x1xf32>
      %92 = vector.broadcast %91 : vector<16x1xf32> to vector<16x16xf32>
      %93 = arith.subf %89, %92 : vector<16x16xf32>
      %94 = math.exp %93 : vector<16x16xf32>
      %cst_29 = arith.constant dense<0.000000e+00> : vector<16xf32>
      %95 = vector.multi_reduction <add>, %94, %cst_29 [1] : vector<16x16xf32> to vector<16xf32>
      %96 = vector.shape_cast %95 : vector<16xf32> to vector<16x1xf32>
      %97 = vector.broadcast %96 : vector<16x1xf32> to vector<16x16xf32>
      %98 = arith.divf %94, %97 : vector<16x16xf32>
      %cst_30 = arith.constant dense<0.000000e+00> : vector<16x8xf32>
      %99 = tpu.matmul %98, %86, %cst_30 {dimension_numbers = #tpu.dot_dimension_numbers<[1], [0], [0], [1], [0, 0, 1, 1], [], []>} : vector<16x16xf32>, vector<16x8xf32>, vector<16x8xf32> -> vector<16x8xf32>
      %100 = vector.extract_strided_slice %51 {offsets = [0, 24], sizes = [16, 8], strides = [1, 1]} : vector<16x96xf32> to vector<16x8xf32>
      %101 = vector.extract_strided_slice %51 {offsets = [0, 56], sizes = [16, 8], strides = [1, 1]} : vector<16x96xf32> to vector<16x8xf32>
      %102 = vector.extract_strided_slice %51 {offsets = [0, 88], sizes = [16, 8], strides = [1, 1]} : vector<16x96xf32> to vector<16x8xf32>
      %103 = tpu.transpose %101, [1, 0] : vector<16x8xf32> -> vector<8x16xf32>
      %cst_31 = arith.constant dense<0.000000e+00> : vector<16x16xf32>
      %104 = tpu.matmul %100, %103, %cst_31 {dimension_numbers = #tpu.dot_dimension_numbers<[1], [0], [0], [1], [0, 0, 1, 1], [], []>} : vector<16x8xf32>, vector<8x16xf32>, vector<16x16xf32> -> vector<16x16xf32>
      %105 = arith.addf %104, %16 : vector<16x16xf32>
      %cst_32 = arith.constant dense<0xFF800000> : vector<16xf32>
      %106 = vector.multi_reduction <maximumf>, %105, %cst_32 [1] : vector<16x16xf32> to vector<16xf32>
      %107 = vector.shape_cast %106 : vector<16xf32> to vector<16x1xf32>
      %108 = vector.broadcast %107 : vector<16x1xf32> to vector<16x16xf32>
      %109 = arith.subf %105, %108 : vector<16x16xf32>
      %110 = math.exp %109 : vector<16x16xf32>
      %cst_33 = arith.constant dense<0.000000e+00> : vector<16xf32>
      %111 = vector.multi_reduction <add>, %110, %cst_33 [1] : vector<16x16xf32> to vector<16xf32>
      %112 = vector.shape_cast %111 : vector<16xf32> to vector<16x1xf32>
      %113 = vector.broadcast %112 : vector<16x1xf32> to vector<16x16xf32>
      %114 = arith.divf %110, %113 : vector<16x16xf32>
      %cst_34 = arith.constant dense<0.000000e+00> : vector<16x8xf32>
      %115 = tpu.matmul %114, %102, %cst_34 {dimension_numbers = #tpu.dot_dimension_numbers<[1], [0], [0], [1], [0, 0, 1, 1], [], []>} : vector<16x16xf32>, vector<16x8xf32>, vector<16x8xf32> -> vector<16x8xf32>
      %116 = tpu.concatenate %67, %83, %99, %115 in 1 : vector<16x8xf32>, vector<16x8xf32>, vector<16x8xf32>, vector<16x8xf32> -> vector<16x32xf32>
      %cst_35 = arith.constant dense<0.000000e+00> : vector<16x32xf32>
      %117 = tpu.matmul %116, %39, %cst_35 {dimension_numbers = #tpu.dot_dimension_numbers<[1], [0], [0], [1], [0, 0, 1, 1], [], []>} : vector<16x32xf32>, vector<32x32xf32>, vector<16x32xf32> -> vector<16x32xf32>
      %118 = vector.broadcast %43 : vector<1x32xf32> to vector<16x32xf32>
      %119 = arith.addf %117, %118 : vector<16x32xf32>
      %120 = arith.addf %arg9, %119 : vector<16x32xf32>
      %cst_36 = arith.constant dense<0.000000e+00> : vector<16xf32>
      %121 = vector.multi_reduction <add>, %120, %cst_36 [1] : vector<16x32xf32> to vector<16xf32>
      %122 = vector.shape_cast %121 : vector<16xf32> to vector<16x1xf32>
      %cst_37 = arith.constant 3.200000e+01 : f32
      %123 = vector.broadcast %cst_37 : f32 to vector<16x1xf32>
      %124 = arith.divf %122, %123 : vector<16x1xf32>
      %125 = vector.broadcast %124 : vector<16x1xf32> to vector<16x32xf32>
      %126 = arith.subf %120, %125 : vector<16x32xf32>
      %127 = arith.mulf %126, %126 : vector<16x32xf32>
      %cst_38 = arith.constant dense<0.000000e+00> : vector<16xf32>
      %128 = vector.multi_reduction <add>, %127, %cst_38 [1] : vector<16x32xf32> to vector<16xf32>
      %129 = vector.shape_cast %128 : vector<16xf32> to vector<16x1xf32>
      %cst_39 = arith.constant 3.200000e+01 : f32
      %130 = vector.broadcast %cst_39 : f32 to vector<16x1xf32>
      %131 = arith.divf %129, %130 : vector<16x1xf32>
      %132 = vector.broadcast %124 : vector<16x1xf32> to vector<16x32xf32>
      %133 = arith.subf %120, %132 : vector<16x32xf32>
      %cst_40 = arith.constant 9.99999974E-6 : f32
      %134 = vector.broadcast %cst_40 : f32 to vector<16x1xf32>
      %135 = arith.addf %131, %134 : vector<16x1xf32>
      %136 = math.rsqrt %135 : vector<16x1xf32>
      %137 = vector.broadcast %136 : vector<16x1xf32> to vector<16x32xf32>
      %138 = arith.mulf %133, %137 : vector<16x32xf32>
      %139 = vector.broadcast %44 : vector<1x32xf32> to vector<16x32xf32>
      %140 = arith.mulf %138, %139 : vector<16x32xf32>
      %141 = vector.broadcast %45 : vector<1x32xf32> to vector<16x32xf32>
      %142 = arith.addf %140, %141 : vector<16x32xf32>
      %cst_41 = arith.constant dense<0.000000e+00> : vector<16x64xf32>
      %143 = tpu.matmul %142, %40, %cst_41 {dimension_numbers = #tpu.dot_dimension_numbers<[1], [0], [0], [1], [0, 0, 1, 1], [], []>} : vector<16x32xf32>, vector<32x64xf32>, vector<16x64xf32> -> vector<16x64xf32>
      %144 = vector.broadcast %42 : vector<1x64xf32> to vector<16x64xf32>
      %145 = arith.addf %143, %144 : vector<16x64xf32>
      %cst_42 = arith.constant 0.000000e+00 : f32
      %146 = vector.broadcast %cst_42 : f32 to vector<16x64xf32>
      %147 = arith.maximumf %145, %146 : vector<16x64xf32>
      %cst_43 = arith.constant dense<0.000000e+00> : vector<16x32xf32>
      %148 = tpu.matmul %147, %34, %cst_43 {dimension_numbers = #tpu.dot_dimension_numbers<[1], [0], [0], [1], [0, 0, 1, 1], [], []>} : vector<16x64xf32>, vector<64x32xf32>, vector<16x32xf32> -> vector<16x32xf32>
      %149 = vector.broadcast %48 : vector<1x32xf32> to vector<16x32xf32>
      %150 = arith.addf %148, %149 : vector<16x32xf32>
      %151 = arith.addf %142, %150 : vector<16x32xf32>
      %cst_44 = arith.constant dense<0.000000e+00> : vector<16xf32>
      %152 = vector.multi_reduction <add>, %151, %cst_44 [1] : vector<16x32xf32> to vector<16xf32>
      %153 = vector.shape_cast %152 : vector<16xf32> to vector<16x1xf32>
      %cst_45 = arith.constant 3.200000e+01 : f32
      %154 = vector.broadcast %cst_45 : f32 to vector<16x1xf32>
      %155 = arith.divf %153, %154 : vector<16x1xf32>
      %156 = vector.broadcast %155 : vector<16x1xf32> to vector<16x32xf32>
      %157 = arith.subf %151, %156 : vector<16x32xf32>
      %158 = arith.mulf %157, %157 : vector<16x32xf32>
      %cst_46 = arith.constant dense<0.000000e+00> : vector<16xf32>
      %159 = vector.multi_reduction <add>, %158, %cst_46 [1] : vector<16x32xf32> to vector<16xf32>
      %160 = vector.shape_cast %159 : vector<16xf32> to vector<16x1xf32>
      %cst_47 = arith.constant 3.200000e+01 : f32
      %161 = vector.broadcast %cst_47 : f32 to vector<16x1xf32>
      %162 = arith.divf %160, %161 : vector<16x1xf32>
      %163 = vector.broadcast %155 : vector<16x1xf32> to vector<16x32xf32>
      %164 = arith.subf %151, %163 : vector<16x32xf32>
      %cst_48 = arith.constant 9.99999974E-6 : f32
      %165 = vector.broadcast %cst_48 : f32 to vector<16x1xf32>
      %166 = arith.addf %162, %165 : vector<16x1xf32>
      %167 = math.rsqrt %166 : vector<16x1xf32>
      %168 = vector.broadcast %167 : vector<16x1xf32> to vector<16x32xf32>
      %169 = arith.mulf %164, %168 : vector<16x32xf32>
      %170 = vector.broadcast %46 : vector<1x32xf32> to vector<16x32xf32>
      %171 = arith.mulf %169, %170 : vector<16x32xf32>
      %172 = vector.broadcast %47 : vector<1x32xf32> to vector<16x32xf32>
      %173 = arith.addf %171, %172 : vector<16x32xf32>
      scf.yield %173 : vector<16x32xf32>
    }
    %c2_i32_6 = arith.constant 2 : i32
    %19 = vector.extract_strided_slice %18 {offsets = [7, 0], sizes = [1, 32], strides = [1, 1]} : vector<16x32xf32> to vector<1x32xf32>
    %20 = vector.extract_strided_slice %18 {offsets = [15, 0], sizes = [1, 32], strides = [1, 1]} : vector<16x32xf32> to vector<1x32xf32>
    %21 = tpu.concatenate %19, %20 in 0 : vector<1x32xf32>, vector<1x32xf32> -> vector<2x32xf32>
    %c0_7 = arith.constant 0 : index
    %c0_8 = arith.constant 0 : index
    %22 = vector.load %arg6[%c0_7, %c0_8] : memref<33x2xf32, #tpu.memory_space<vmem>>, vector<33x2xf32>
    %23 = vector.extract_strided_slice %22 {offsets = [0, 0], sizes = [32, 2], strides = [1, 1]} : vector<33x2xf32> to vector<32x2xf32>
    %cst_9 = arith.constant dense<0.000000e+00> : vector<2x2xf32>
    %24 = tpu.matmul %21, %23, %cst_9 {dimension_numbers = #tpu.dot_dimension_numbers<[1], [0], [0], [1], [0, 0, 1, 1], [], []>} : vector<2x32xf32>, vector<32x2xf32>, vector<2x2xf32> -> vector<2x2xf32>
    %25 = vector.extract_strided_slice %22 {offsets = [32, 0], sizes = [1, 2], strides = [1, 1]} : vector<33x2xf32> to vector<1x2xf32>
    %26 = vector.broadcast %25 : vector<1x2xf32> to vector<2x2xf32>
    %27 = arith.addf %24, %26 : vector<2x2xf32>
    %c0_10 = arith.constant 0 : index
    %c0_11 = arith.constant 0 : index
    %28 = vector.load %arg7[%c0_10, %c0_11] : memref<2x2xf32, #tpu.memory_space<vmem>>, vector<2x2xf32>
    tpu.vector_store %arg7[%c0_10, %c0_11], %27 {strides = array<i32>} : memref<2x2xf32, #tpu.memory_space<vmem>>, vector<2x2xf32>,
    return
  }
  func.func @transform_0(%arg0: i32) -> (i32, i32) {
    %c0_i32 = arith.constant 0 : i32
    %c0_i32_0 = arith.constant 0 : i32
    %c0_i32_1 = arith.constant 0 : i32
    return %c0_i32, %c0_i32_0 : i32, i32
  }
  func.func @transform_1(%arg0: i32) -> (i32, i32) {
    %c0_i32 = arith.constant 0 : i32
    %c0_i32_0 = arith.constant 0 : i32
    %c0_i32_1 = arith.constant 0 : i32
    return %c0_i32, %c0_i32_0 : i32, i32
  }
  func.func @transform_2(%arg0: i32) -> (i32, i32, i32) {
    %c0_i32 = arith.constant 0 : i32
    %c0_i32_0 = arith.constant 0 : i32
    %c0_i32_1 = arith.constant 0 : i32
    %c0_i32_2 = arith.constant 0 : i32
    return %c0_i32, %c0_i32_0, %c0_i32_1 : i32, i32, i32
  }
  func.func @transform_3(%arg0: i32) -> (i32, i32, i32) {
    %c0_i32 = arith.constant 0 : i32
    %c0_i32_0 = arith.constant 0 : i32
    %c0_i32_1 = arith.constant 0 : i32
    %c0_i32_2 = arith.constant 0 : i32
    return %c0_i32, %c0_i32_0, %c0_i32_1 : i32, i32, i32
  }
  func.func @transform_4(%arg0: i32) -> (i32, i32, i32) {
    %c0_i32 = arith.constant 0 : i32
    %c0_i32_0 = arith.constant 0 : i32
    %c0_i32_1 = arith.constant 0 : i32
    %c0_i32_2 = arith.constant 0 : i32
    return %c0_i32, %c0_i32_0, %c0_i32_1 : i32, i32, i32
  }
  func.func @transform_5(%arg0: i32) -> (i32, i32) {
    %c0_i32 = arith.constant 0 : i32
    %c0_i32_0 = arith.constant 0 : i32
    %c0_i32_1 = arith.constant 0 : i32
    return %c0_i32, %c0_i32_0 : i32, i32
  }
  func.func @transform_6(%arg0: i32) -> (i32, i32) {
    %c0_i32 = arith.constant 0 : i32
    %c0_i32_0 = arith.constant 0 : i32
    %c0_i32_1 = arith.constant 0 : i32
    return %c0_i32, %c0_i32_0 : i32, i32
  }
}

</mosaic_0001>

<bundles_post_ra>
// kernel: tpu_custom_call.1
= control target key start
LH: loop header
LB: loop body
LE: loop exit
PB: predicated region body
PF: predicated region fallthrough
CT: control target
= control target key end

     0   :  { %11 = vsyncpa [#allocation3], 0  ;;  %vm38_vm0 = vcmask 1041408   ;;  %vm31_vm1 = vcmask 15360   ;;  %v27_v3 = vlaneseq  ;;  %v2057_v10 = vmov -1e+30   ;;  %s2375_s0 = inlined_call_operand.vmem [shape: f32[16,2], index: 0, kind: input, shape index: {}]   ;;  %s2376_s1 = inlined_call_operand.vmem [shape: f32[3,32], index: 1, kind: input, shape index: {}]   ;;  %s2377_s2 = inlined_call_operand.vmem [shape: f32[2,32,192], index: 2, kind: input, shape index: {}]   ;;  %s2378_s3 = inlined_call_operand.vmem [shape: f32[2,64,32], index: 3, kind: input, shape index: {}]   ;;  %s2379_s4 = inlined_call_operand.vmem [shape: f32[2,8,96], index: 4, kind: input, shape index: {}]   ;;  %s2380_s5 = inlined_call_operand.vmem [shape: f32[33,2], index: 5, kind: input, shape index: {}]   ;;  %s2381_s6 = inlined_call_operand.hbm [shape: f32[2,2], index: 6, kind: output, shape index: {}]  }
   0x1   :  { %v24_v0 = vld [vmem:[%s2376_s1] sm:$0x7]  ;;  %v26_v2 = vld [vmem:[%s2375_s0 + $0x8] sm:$0xff] }
   0x2   :  { %v25_v1 = vld [vmem:[%s2375_s0] sm:$0xff]  ;;  %1665 = vmatprep.subr.msk.mxu0 %vm38_vm0, %v24_v0  ;;  %v2121_v4 = vshrl.u32 %v27_v3, 7  ;;  %v123_v6 = vand.u32 127, %v27_v3  ;;  %s2136_s0 = smov 0  }
   0x3   :  { %1666 = vmatpush3.msk.msra.mxu0 %vm38_vm0, %v24_v0  ;;  %1667 = vmatprep.mubr.msk.f32.mxu0 %vm31_vm1, %v25_v1 }
   0x4   :  { %1668 = vmatmul.mubr.msk.f32.vlgmr.msra.gmra.mrb[0].mxu0 %vm31_vm1, %v26_v2  ;;  %v119_v5 = vadd.s32 8, %v2121_v4  ;;  %v120_v7 = vshra.s32 %v2121_v4, 3  ;;  %v124_v9 = vshra.s32 %v123_v6, 3  ;;  %v29_v13 = vsub.s32 2, %v2121_v4 }
   0x6   :  { %v121_v8 = vshra.s32 %v119_v5, 3  ;;  %vm125_vm2 = vcmp.eq.s32.totalorder %v120_v7, %v124_v9  ;;  %v30_v14 = vrot.slane %v24_v0, %v29_v13 }
   0x7   :  { %v2125_v11 = vsel %vm125_vm2, 0.0, %v2057_v10 }
   0x8   :  { %vm126_vm3 = vcmp.eq.s32.totalorder %v121_v8, %v124_v9 }
   0x9   :  { %v2127_v12 = vsel %vm126_vm3, 0.0, %v2057_v10 }
  0xd7   :  { %v1669_v15 = vpop.f32.mrb[0].mxu0 }
  0xd8   :  { %v114_v16 = vadd.f32 %v1669_v15, %v30_v14   ;;  %v108_v17 = vpop.f32.mrb[1].mxu0 }
  0xd9   :  { %v109_v18 = vadd.f32 %v108_v17, %v30_v14  }
  0xda LB: > { %vm164_vm4 = vcmask 261120   ;;  %s1596_s1 = sshll.u32 %s2055_s0, 6  ;;  %s1559_s30 = sshll.u32 %s2055_s0, 3  ;;  %v162_v26 = vsub.s32 0, %v2121_v4  ;;  %vm252_vm5 = vcmask 64512   ;;  %vm336_vm7 = vcmask 130048   ;;  %s2055_s0 = sphi %s2136_s0, %s134_s0   ;;  %v2051_v18 = vphi %v109_v18, %v2385_v18   ;;  %v2047_v16 = vphi %v114_v16, %v2384_v16  }
  0xdb   : > { %1678 = vmatprep.mubr.msk.f32.mxu1 %vm164_vm4, %v2051_v18  ;;  %s2155_s29 = scalar_lea.vmem %s2377_s2, %s1596_s1  ;;  %s158_s9 = scalar_lea.vmem %s2379_s4, %s1559_s30  ;;  %vm2201_vm6 = vmpackc.low %vm252_vm5, %vm252_vm5  ;;  %vm1074_vm8 = vcmask 195584   ;;  %vm1310_vm9 = vcmask 523264  }
  0xdc   : > { %v2158_v19 = vld [vmem:[%s2155_s29] sm:$0xff]  ;;  %v2161_v20 = vld [vmem:[%s2155_s29 + $0x10] sm:$0xff]  ;;  %s2058_s10 = smov 120   ;;  %s2059_s11 = smov 96  }
  0xdd   : > { %v2164_v21 = vld [vmem:[%s2155_s29 + $0x20] sm:$0xff]  ;;  %v1959_v22 = vpack.i.bf16 %v2161_v20, %v2158_v19  ;;  %v1789_v23 = vpack.c.bf16 %v2161_v20, %v2158_v19  ;;  %v2171_v24 = vld [vmem:[%s2155_s29 + $0x30] sm:$0xff]  ;;  %s2060_s12 = smov 88   ;;  %s2061_s13 = smov 64  }
  0xde   : > { %v1793_v25 = vpack.c.bf16 %v2171_v24, %v2164_v21  ;;  %v2182_v27 = vld [vmem:[%s158_s9] sm:$0xff]  ;;  %s2062_s14 = smov 80   ;;  %s2063_s15 = smov 56  }
  0xdf   : > { %1790 = vmatprep.subr.bf16.mxu1 %v1789_v23  ;;  %v163_v28 = vrot.slane %v2182_v27, %v162_v26  ;;  %s2064_s16 = smov 112   ;;  %s2065_s17 = smov 72  }
  0xe0   : > { %1792 = vmatpush3.bf16.msra.mxu1 %v1789_v23  ;;  %s2066_s18 = smov 104   ;;  %s2067_s19 = smov 48  }
  0xe1   : > { %1794 = vmatprep.subr.bf16.mxu1 %v1793_v25  ;;  %s2068_s20 = smov 32   ;;  %s2069_s21 = smov 40  }
  0xe2   : > { %s2070_s22 = smov 8   ;;  %s2071_s23 = smov 16  }
  0xe3   : > { %s2072_s24 = smov 24   ;;  %s2312_s27 = scalar_lea.vmem %s2378_s3, %s1596_s1 }
  0xe4   : > { %1796 = vmatpush3.bf16.msra.mxu1 %v1793_v25  ;;  %s134_s0 = sadd.s32 1, %s2055_s0  }
  0xe5   : > { %p131_p0 = scmp.ge.s32.totalorder %s134_s0, 2  }
  0xe6   :  { %vm2074_vm10 = vmmov (%p131_p0), 0   ;;  %vm1438_vm11 = vcmask (%p131_p0), 1040384   ;;  %s2076_s4 = smov (%p131_p0), [#allocation2]   ;;  %vm1523_vm12 = vcmask (%p131_p0), 9216  }
  0xe7   : > { %1679 = vmatmul.mubr.msk.f32.vlgmr.msra.gmra.mrb[0].mxu1 %vm164_vm4, %v2047_v16  ;;  %s1531_s0 = sshll.u32 (%p131_p0), %s2076_s4, 4  ;;  %s1532_s0 = int_to_ptr.vmem [resolvable:$true] %s1531_s0 }
  0xe8   :  { %p2014_p2 = scmp.lt.s32.totalorder (%p131_p0), %s1532_s0, %s1532_s0 }
 0x1ba   : > { %v1680_v29 = vpop.f32.mrb[0].mxu1 }
 0x1bb   : > { %v2185_v30 = vadd.f32 %v1680_v29, %v163_v28  ;;  %v237_v31 = vpop.f32.mrb[1].mxu1 }
 0x1bc   : > { %v2187_v32 = vadd.f32 %v237_v31, %v163_v28 }
 0x1be   : > { %446 = vrot.lane.b32.xlu1 %v2187_v32, %s2058_s10  ;;  %1685 = vmatprep.mubr.msk.f32.mxu1 %vm252_vm5, %v2187_v32  ;;  %v2194_v33 = vpack.i.bf16 %v2185_v30, %v2187_v32 }
 0x1c0   : > { %1920 = vrot.lane.b32.xlu0 %v2194_v33, %s2059_s11  ;;  %s2009_s11 = scalar_lea.vmem (%p131_p0), %s1532_s0, 32 }
 0x1c1   :  { %p2010_p1 = scmp.ne.s32.totalorder (%p131_p0), %s1532_s0, %s2009_s11  ;;  %p2015_p3 = scmp.lt.s32.totalorder (%p131_p0), %s2009_s11, %s2009_s11 }
 0x1c2   : > { %448 = vrot.lane.b32.xlu1 %v2185_v30, %s2058_s10 }
 0x1c3   :  { %p2016_p4 = por (%p131_p0), %p2015_p3, %p2014_p2 }
 0x1c4   : > { %1925 = vrot.lane.b32.xlu0 %v2194_v33, %s2060_s12 }
 0x1c5   :  { %p2017_p5 = pnand (%p131_p0), %p2016_p4, %p2010_p1 }
 0x230   : > { %v447_v43 = vpop.permute.xlu1 %446 }
 0x232   : > { %v1921_v34 = vpop.permute.xlu0 %1920 }
 0x233   : > { %v1923_v35 = vunpack.i.h.bf16 %v1921_v34  ;;  %v1922_v36 = vunpack.i.l.bf16 %v1921_v34 }
 0x234   : > { %v449_v44 = vpop.permute.xlu1 %448 }
 0x235   : > { %v1797_v38 = vpack.c.bf16 %v1923_v35, %v1922_v36 }
 0x236   : > { %v1926_v39 = vpop.permute.xlu0 %1925 }
 0x237   : > { %v1928_v40 = vunpack.i.h.bf16 %v1926_v39  ;;  %v1927_v41 = vunpack.i.l.bf16 %v1926_v39  ;;  %1799 = vmatprep.subr.msk.bf16.mxu1 %vm2201_vm6, %v1797_v38 }
 0x238   : > { %1802 = vmatpush3.bf16.xpose.msk.msra.mxu1 %vm2201_vm6, %v1797_v38 }
 0x239   : > { %v1807_v42 = vpack.c.bf16 %v1928_v40, %v1927_v41 }
 0x23b   : > { %1809 = vmatprep.subr.msk.bf16.mxu1 %vm2201_vm6, %v1807_v42 }
 0x23f   : > { %1686 = vmatmul.mubr.msk.f32.vlgmr.msra.gmra.mrb[2].mxu1 %vm252_vm5, %v2185_v30 }
 0x240   : > { %1812 = vmatpush3.bf16.xpose.msk.msra.mxu1 %vm2201_vm6, %v1807_v42  ;;  %1699 = vmatprep.mubr.msk.f32.mxu1 %vm252_vm5, %v447_v43 }
 0x247   : > { %1700 = vmatmul.mubr.msk.f32.vlgmr.msra.gmra.mrb[4].mxu1 %vm252_vm5, %v449_v44 }
 0x312   : > { %v1687_v45 = vpop.f32.mrb[2].mxu1 }
 0x313   : > { %v333_v46 = vadd.f32 %v1687_v45, %v2127_v12  ;;  %v327_v47 = vpop.f32.mrb[3].mxu1 }
 0x314   : > { %v328_v48 = vadd.f32 %v327_v47, %v2125_v11 }
 0x315   : > { %v340_v49 = vsel %vm336_vm7, %v333_v46, -inf }
 0x316   : > { %341 = vmax.xlane.f32.xlu1 %v340_v49  ;;  %v337_v50 = vsel %vm336_vm7, %v328_v48, -inf }
 0x317   : > { %338 = vmax.xlane.f32.xlu0 %v337_v50 }
 0x31a   : > { %v1701_v51 = vpop.f32.mrb[4].mxu1 }
 0x31b   : > { %v528_v52 = vpop.f32.mrb[5].mxu1  ;;  %v534_v54 = vadd.f32 %v1701_v51, %v2127_v12 }
 0x31c   : > { %v529_v53 = vadd.f32 %v528_v52, %v2125_v11 }
 0x31d   : > { %v540_v56 = vsel %vm336_vm7, %v534_v54, -inf }
 0x31e   : > { %v537_v55 = vsel %vm336_vm7, %v529_v53, -inf }
 0x31f   : > { %538 = vmax.xlane.f32.xlu0 %v537_v55 }
 0x323   : > { %541 = vmax.xlane.f32.xlu0 %v540_v56 }
 0x327   : > { %1930 = vrot.lane.b32.xlu1 %v2194_v33, %s2061_s13 }
 0x3a3   : > { %v342_v57 = vpop.xlane.xlu1 %341 }
 0x3a4   : > { %v344_v58 = vsub.f32 %v333_v46, %v342_v57  ;;  %v339_v59 = vpop.xlane.xlu0 %338 }
 0x3a5   : > { %v343_v60 = vsub.f32 %v328_v48, %v339_v59 }
 0x3a6   : > { %v347_v61 = vmul.f32 1.442695, %v344_v58 }
 0x3a7   : > { %v345_v62 = vmul.f32 1.442695, %v343_v60  ;;  %v1931_v63 = vpop.permute.xlu1 %1930 }
 0x3a8   : > { %1969 = vpow2.f32 %v347_v61  ;;  %v1933_v0 = vunpack.i.h.bf16 %v1931_v63  ;;  %v1932_v1 = vunpack.i.l.bf16 %v1931_v63 }
 0x3a9   : > { %1971 = vpow2.f32 %v345_v62 }
 0x3aa   : > { %v1803_v2 = vpack.c.bf16 %v1933_v0, %v1932_v1 }
 0x3ac   : > { %1804 = vmatprep.subr.bf16.mxu0 %v1803_v2  ;;  %v539_v3 = vpop.xlane.xlu0 %538 }
 0x3ad   : > { %1806 = vmatpush3.bf16.msra.mxu0 %v1803_v2  ;;  %v543_v23 = vsub.f32 %v529_v53, %v539_v3 }
 0x3af   : > { %v545_v25 = vmul.f32 1.442695, %v543_v23 }
 0x3b0   : > { %v542_v5 = vpop.xlane.xlu0 %541 }
 0x3b1   : > { %v544_v6 = vsub.f32 %v534_v54, %v542_v5 }
 0x3b2   : > { %v1970_v7 = vpop.eup %1969 }
 0x3b3   : > { %v1972_v8 = vpop.eup %1971  ;;  %v547_v9 = vmul.f32 1.442695, %v544_v6  ;;  %v352_v10 = vsel %vm336_vm7, %v1970_v7, 0.0 }
 0x3b4   : > { %353 = vadd.xlane.f32.xlu0 %v352_v10  ;;  %v349_v14 = vsel %vm336_vm7, %v1972_v8, 0.0 }
 0x3b5   : > { %1973 = vpow2.f32 %v547_v9  ;;  %350 = vadd.xlane.f32.xlu1 %v349_v14 }
 0x3b6   : > { %1975 = vpow2.f32 %v545_v25 }
 0x3bf   : > { %v1974_v15 = vpop.eup %1973 }
 0x3c0   : > { %v552_v17 = vsel %vm336_vm7, %v1974_v15, 0.0  ;;  %v1976_v26 = vpop.eup %1975 }
 0x3c1   : > { %553 = vadd.xlane.f32.xlu0 %v552_v17  ;;  %v549_v28 = vsel %vm336_vm7, %v1976_v26, 0.0 }
 0x3c6   : > { %1940 = vrot.lane.b32.xlu1 %v2194_v33, %s2062_s14 }
 0x3d7   : > { %1935 = vrot.lane.b32.xlu0 %v2194_v33, %s2063_s15 }
 0x3db   : > { %648 = vrot.lane.b32.xlu0 %v2185_v30, %s2064_s16 }
 0x3ea   : > { %550 = vadd.xlane.f32.xlu1 %v549_v28 }
 0x3fb   : > { %646 = vrot.lane.b32.xlu1 %v2187_v32, %s2064_s16 }
 0x441   : > { %v354_v29 = vpop.xlane.xlu0 %353 }
 0x442   : > { %1977 = vrcp.f32 %v354_v29  ;;  %v351_v31 = vpop.xlane.xlu1 %350 }
 0x443   : > { %1979 = vrcp.f32 %v351_v31 }
 0x446   : > { %v1941_v40 = vpop.permute.xlu1 %1940 }
 0x447   : > { %v1943_v42 = vunpack.i.h.bf16 %v1941_v40  ;;  %v1942_v43 = vunpack.i.l.bf16 %v1941_v40 }
 0x449   : > { %v1817_v47 = vpack.c.bf16 %v1943_v42, %v1942_v43 }
 0x44c   : > { %v1978_v34 = vpop.eup %1977 }
 0x44d   : > { %v1980_v35 = vpop.eup %1979  ;;  %v358_v39 = vmul.f32 %v1978_v34, %v1970_v7 }
 0x44e   : > { %v554_v36 = vpop.xlane.xlu0 %553  ;;  %v356_v38 = vmul.f32 %v1980_v35, %v1972_v8 }
 0x44f   : > { %1981 = vrcp.f32 %v554_v36 }
 0x450   : > { %1692 = vmatprep.mubr.msk.f32.mxu0 %vm336_vm7, %v356_v38 }
 0x451   : > { %1693 = vmatmul.mubr.msk.f32.vlgmr.msra.gmra.mrb[0].mxu0 %vm336_vm7, %v358_v39 }
 0x452   : > { %v1936_v41 = vpop.permute.xlu0 %1935 }
 0x453   : > { %v1938_v44 = vunpack.i.h.bf16 %v1936_v41  ;;  %v1937_v45 = vunpack.i.l.bf16 %v1936_v41 }
 0x455   : > { %v1813_v46 = vpack.c.bf16 %v1938_v44, %v1937_v45 }
 0x456   : > { %v649_v54 = vpop.permute.xlu0 %648 }
 0x457   : > { %1814 = vmatprep.subr.bf16.mxu0 %v1813_v46 }
 0x458   : > { %1816 = vmatpush3.bf16.msra.mxu0 %v1813_v46 }
 0x459   : > { %1819 = vmatprep.subr.msk.bf16.mxu0 %vm2201_vm6, %v1817_v47  ;;  %v1982_v49 = vpop.eup %1981 }
 0x45a   : > { %v558_v52 = vmul.f32 %v1982_v49, %v1974_v15 }
 0x477   : > { %v551_v48 = vpop.xlane.xlu1 %550 }
 0x478   : > { %1983 = vrcp.f32 %v551_v48 }
 0x47b   : > { %v647_v53 = vpop.permute.xlu1 %646 }
 0x482   : > { %v1984_v50 = vpop.eup %1983 }
 0x483   : > { %v556_v51 = vmul.f32 %v1984_v50, %v1976_v26 }
 0x485   : > { %1706 = vmatprep.mubr.msk.f32.mxu0 %vm336_vm7, %v556_v51 }
 0x486   : > { %1707 = vmatmul.mubr.msk.f32.vlgmr.msra.gmra.mrb[2].mxu0 %vm336_vm7, %v558_v52 }
 0x487   : > { %1822 = vmatpush3.bf16.xpose.msk.msra.mxu0 %vm2201_vm6, %v1817_v47  ;;  %1713 = vmatprep.mubr.msk.f32.mxu0 %vm252_vm5, %v647_v53 }
 0x48e   : > { %1714 = vmatmul.mubr.msk.f32.vlgmr.msra.gmra.mrb[4].mxu0 %vm252_vm5, %v649_v54 }
 0x524   : > { %v2244_v55 = vpop.f32.mrb[0].mxu0 }
 0x525   : > { %v2246_v56 = vpop.f32.mrb[1].mxu0 }
 0x559   : > { %v2248_v57 = vpop.f32.mrb[2].mxu0 }
 0x55a   : > { %v2250_v58 = vpop.f32.mrb[3].mxu0 }
 0x561   : > { %v1715_v59 = vpop.f32.mrb[4].mxu0 }
 0x562   : > { %v734_v60 = vadd.f32 %v1715_v59, %v2127_v12  ;;  %v728_v61 = vpop.f32.mrb[5].mxu0 }
 0x563   : > { %v729_v62 = vadd.f32 %v728_v61, %v2125_v11 }
 0x564   : > { %v740_v63 = vsel %vm336_vm7, %v734_v60, -inf }
 0x565   : > { %741 = vmax.xlane.f32.xlu0 %v740_v63  ;;  %v737_v0 = vsel %vm336_vm7, %v729_v62, -inf }
 0x566   : > { %738 = vmax.xlane.f32.xlu1 %v737_v0 }
 0x5f2   : > { %v742_v1 = vpop.xlane.xlu0 %741 }
 0x5f3   : > { %v744_v2 = vsub.f32 %v734_v60, %v742_v1  ;;  %v739_v3 = vpop.xlane.xlu1 %738 }
 0x5f4   : > { %v743_v5 = vsub.f32 %v729_v62, %v739_v3  ;;  %v1964_v62 = vpack.i.bf16 %v2171_v24, %v2164_v21 }
 0x5f5   : > { %v747_v6 = vmul.f32 1.442695, %v744_v2 }
 0x5f6   : > { %v745_v7 = vmul.f32 1.442695, %v743_v5 }
 0x5f7   : > { %1985 = vpow2.f32 %v747_v6 }
 0x5f8   : > { %1987 = vpow2.f32 %v745_v7 }
 0x601   : > { %v1986_v8 = vpop.eup %1985 }
 0x602   : > { %v1988_v9 = vpop.eup %1987  ;;  %v752_v10 = vsel %vm336_vm7, %v1986_v8, 0.0 }
 0x603   : > { %753 = vadd.xlane.f32.xlu1 %v752_v10  ;;  %v749_v14 = vsel %vm336_vm7, %v1988_v9, 0.0 }
 0x604   : > { %750 = vadd.xlane.f32.xlu0 %v749_v14 }
 0x614   : > { %1950 = vrot.lane.b32.xlu1 %v2194_v33, %s2065_s17 }
 0x618   : > { %846 = vrot.lane.b32.xlu1 %v2187_v32, %s2066_s18 }
 0x61a   : > { %1945 = vrot.lane.b32.xlu0 %v2194_v33, %s2067_s19 }
 0x61e   : > { %848 = vrot.lane.b32.xlu0 %v2185_v30, %s2066_s18 }
 0x690   : > { %v754_v15 = vpop.xlane.xlu1 %753 }
 0x691   : > { %1989 = vrcp.f32 %v754_v15  ;;  %v751_v17 = vpop.xlane.xlu0 %750 }
 0x692   : > { %1991 = vrcp.f32 %v751_v17 }
 0x694   : > { %v1951_v23 = vpop.permute.xlu1 %1950 }
 0x695   : > { %v1946_v25 = vpop.permute.xlu0 %1945  ;;  %v1953_v26 = vunpack.i.h.bf16 %v1951_v23  ;;  %v1952_v28 = vunpack.i.l.bf16 %v1951_v23 }
 0x696   : > { %v1948_v29 = vunpack.i.h.bf16 %v1946_v25  ;;  %v1947_v31 = vunpack.i.l.bf16 %v1946_v25 }
 0x697   : > { %v1827_v35 = vpack.c.bf16 %v1953_v26, %v1952_v28 }
 0x698   : > { %v1823_v34 = vpack.c.bf16 %v1948_v29, %v1947_v31  ;;  %v847_v39 = vpop.permute.xlu1 %846 }
 0x699   : > { %v849_v40 = vpop.permute.xlu0 %848 }
 0x69a   : > { %1824 = vmatprep.subr.bf16.mxu1 %v1823_v34 }
 0x69b   : > { %v1990_v36 = vpop.eup %1989  ;;  %1826 = vmatpush3.bf16.msra.mxu1 %v1823_v34 }
 0x69c   : > { %v1992_v32 = vpop.eup %1991  ;;  %1829 = vmatprep.subr.msk.bf16.mxu1 %vm2201_vm6, %v1827_v35  ;;  %v758_v38 = vmul.f32 %v1990_v36, %v1986_v8 }
 0x69d   : > { %v756_v30 = vmul.f32 %v1992_v32, %v1988_v9 }
 0x69f   : > { %1720 = vmatprep.mubr.msk.f32.mxu1 %vm336_vm7, %v756_v30  ;;  %v1080_v30 = vrot.slane %v2182_v27, %v29_v13 }
 0x6a0   : > { %1721 = vmatmul.mubr.msk.f32.vlgmr.msra.gmra.mrb[6].mxu1 %vm336_vm7, %v758_v38 }
 0x6a1   : > { %1727 = vmatprep.mubr.msk.f32.mxu1 %vm252_vm5, %v847_v39 }
 0x6a4   : > { %1832 = vmatpush3.bf16.xpose.msk.msra.mxu1 %vm2201_vm6, %v1827_v35 }
 0x6ab   : > { %1728 = vmatmul.mubr.msk.f32.vlgmr.msra.gmra.mrb[8].mxu1 %vm252_vm5, %v849_v40 }
 0x773   : > { %v1722_v41 = vpop.f32.mrb[6].mxu1 }
 0x774   : > { %v837_v42 = vpop.f32.mrb[7].mxu1 }
 0x77e   : > { %v1729_v43 = vpop.f32.mrb[8].mxu1 }
 0x77f   : > { %v934_v44 = vadd.f32 %v1729_v43, %v2127_v12  ;;  %v928_v45 = vpop.f32.mrb[9].mxu1 }
 0x780   : > { %v929_v46 = vadd.f32 %v928_v45, %v2125_v11 }
 0x781   : > { %v940_v47 = vsel %vm336_vm7, %v934_v44, -inf }
 0x782   : > { %941 = vmax.xlane.f32.xlu0 %v940_v47  ;;  %v937_v48 = vsel %vm336_vm7, %v929_v46, -inf }
 0x783   : > { %938 = vmax.xlane.f32.xlu1 %v937_v48 }
 0x80f   : > { %v942_v49 = vpop.xlane.xlu0 %941 }
 0x810   : > { %v944_v37 = vsub.f32 %v934_v44, %v942_v49  ;;  %v939_v50 = vpop.xlane.xlu1 %938 }
 0x811   : > { %v943_v51 = vsub.f32 %v929_v46, %v939_v50 }
 0x812   : > { %v947_v52 = vmul.f32 1.442695, %v944_v37 }
 0x813   : > { %v945_v53 = vmul.f32 1.442695, %v943_v51  ;;  %v141_v51 = vld [vmem:[%s2155_s29 + $0x8] sm:$0xff] }
 0x814   : > { %1993 = vpow2.f32 %v947_v52  ;;  %v143_v52 = vld [vmem:[%s2155_s29 + $0x18] sm:$0xff] }
 0x815   : > { %1995 = vpow2.f32 %v945_v53  ;;  %v1845_v53 = vpack.c.bf16 %v143_v52, %v141_v51 }
 0x817   : > { %1846 = vmatprep.subr.bf16.mxu1 %v1845_v53 }
 0x818   : > { %1848 = vmatpush3.bf16.msra.mxu1 %v1845_v53 }
 0x81e   : > { %v1994_v54 = vpop.eup %1993 }
 0x81f   : > { %v1996_v59 = vpop.eup %1995  ;;  %v952_v60 = vsel %vm336_vm7, %v1994_v54, 0.0 }
 0x820   : > { %953 = vadd.xlane.f32.xlu1 %v952_v60  ;;  %v949_v61 = vsel %vm336_vm7, %v1996_v59, 0.0 }
 0x821   : > { %950 = vadd.xlane.f32.xlu0 %v949_v61  ;;  %v150_v61 = vld [vmem:[%s2312_s27] sm:$0xff] }
 0x831   : > { %1960 = vrot.lane.b32.xlu1 %v1959_v22, %s2068_s20 }
 0x835   : > { %1965 = vrot.lane.b32.xlu1 %v1964_v62, %s2068_s20  ;;  %v151_v62 = vld [vmem:[%s2312_s27 + $0x8] sm:$0xff] }
 0x837   : > { %1955 = vrot.lane.b32.xlu0 %v2194_v33, %s2069_s21 }
 0x839   : > { %1050 = vrot.lane.b32.xlu1 %v2248_v57, %s2070_s22 }
 0x83b   : > { %1048 = vrot.lane.b32.xlu0 %v2250_v58, %s2070_s22 }
 0x83d   : > { %1058 = vrot.lane.b32.xlu1 %v1722_v41, %s2071_s23 }
 0x83f   : > { %1056 = vrot.lane.b32.xlu0 %v837_v42, %s2071_s23 }
 0x8ad   : > { %v954_v63 = vpop.xlane.xlu1 %953 }
 0x8ae   : > { %1997 = vrcp.f32 %v954_v63  ;;  %v951_v0 = vpop.xlane.xlu0 %950  ;;  %v152_v63 = vld [vmem:[%s2312_s27 + $0x10] sm:$0xff] }
 0x8af   : > { %1999 = vrcp.f32 %v951_v0  ;;  %v1853_v0 = vpack.c.bf16 %v151_v62, %v150_v61 }
 0x8b1   : > { %v1961_v19 = vpop.permute.xlu1 %1960 }
 0x8b2   : > { %v1963_v20 = vunpack.i.h.bf16 %v1961_v19  ;;  %v1962_v22 = vunpack.i.l.bf16 %v1961_v19  ;;  %v1956_v21 = vpop.permute.xlu0 %1955  ;;  %v153_v19 = vld [vmem:[%s2312_s27 + $0x18] sm:$0xff] }
 0x8b3   : > { %v1958_v24 = vunpack.i.h.bf16 %v1956_v21  ;;  %v1957_v1 = vunpack.i.l.bf16 %v1956_v21  ;;  %v155_v21 = vld [vmem:[%s2312_s27 + $0x28] sm:$0xff] }
 0x8b4   : > { %v1837_v2 = vpack.c.bf16 %v1963_v20, %v1962_v22  ;;  %v1857_v20 = vpack.c.bf16 %v153_v19, %v152_v63  ;;  %v154_v22 = vld [vmem:[%s2312_s27 + $0x20] sm:$0xff] }
 0x8b5   : > { %v1833_v33 = vpack.c.bf16 %v1958_v24, %v1957_v1  ;;  %v1966_v3 = vpop.permute.xlu1 %1965  ;;  %v1861_v24 = vpack.c.bf16 %v155_v21, %v154_v22  ;;  %v1428_v22 = vsub.s32 6, %v2121_v4 }
 0x8b6   : > { %v1968_v5 = vunpack.i.h.bf16 %v1966_v3  ;;  %v1967_v57 = vunpack.i.l.bf16 %v1966_v3  ;;  %v1049_v17 = vpop.permute.xlu0 %1048 }
 0x8b7   : > { %1834 = vmatprep.subr.bf16.mxu0 %v1833_v33  ;;  %v1070_v26 = vsel %vm252_vm5, %v2246_v56, %v1049_v17 }
 0x8b8   : > { %v1998_v58 = vpop.eup %1997  ;;  %1836 = vmatpush3.bf16.msra.mxu0 %v1833_v33  ;;  %v1841_v9 = vpack.c.bf16 %v1968_v5, %v1967_v57 }
 0x8b9   : > { %v2000_v6 = vpop.eup %1999  ;;  %1838 = vmatprep.subr.bf16.mxu0 %v1837_v2  ;;  %v958_v8 = vmul.f32 %v1998_v58, %v1994_v54  ;;  %v1051_v15 = vpop.permute.xlu1 %1050  ;;  %v145_v54 = vld [vmem:[%s2155_s29 + $0x28] sm:$0xff]  ;;  %v1209_v58 = vsub.s32 3, %v2121_v4 }
 0x8ba   : > { %v956_v7 = vmul.f32 %v2000_v6, %v1996_v59  ;;  %v1057_v25 = vpop.permute.xlu0 %1056  ;;  %v1071_v29 = vsel %vm252_vm5, %v2244_v55, %v1051_v15  ;;  %v147_v59 = vld [vmem:[%s2155_s29 + $0x38] sm:$0xff]  ;;  %v1215_v6 = vsub.s32 4, %v2121_v4 }
 0x8bb   : > { %v1072_v31 = vsel %vm336_vm7, %v1070_v26, %v1057_v25  ;;  %v1849_v60 = vpack.c.bf16 %v147_v59, %v145_v54 }
 0x8bc   : > { %1734 = vmatprep.mubr.msk.f32.mxu0 %vm336_vm7, %v956_v7  ;;  %v1210_v7 = vrot.slane %v2182_v27, %v1209_v58 }
 0x8bd   : > { %1735 = vmatmul.mubr.msk.f32.vlgmr.msra.gmra.mrb[6].mxu0 %vm336_vm7, %v958_v8  ;;  %v1059_v23 = vpop.permute.xlu1 %1058  ;;  %1850 = vmatprep.subr.bf16.mxu1 %v1849_v60 }
 0x8be   : > { %1840 = vmatpush3.bf16.msra.mxu0 %v1837_v2  ;;  %v1073_v35 = vsel %vm336_vm7, %v1071_v29, %v1059_v23  ;;  %1852 = vmatpush3.bf16.msra.mxu1 %v1849_v60  ;;  %v157_v29 = vld [vmem:[%s2312_s27 + $0x38] sm:$0xff] }
 0x8bf   : > { %1842 = vmatprep.subr.bf16.mxu0 %v1841_v9 }
 0x8c2   : > { %1844 = vmatpush3.bf16.msra.mxu0 %v1841_v9 }
 0x8c3   : > { %1854 = vmatprep.subr.bf16.mxu0 %v1853_v0 }
 0x990   : > { %v1736_v10 = vpop.f32.mrb[6].mxu0 }
 0x991   : > { %1066 = vrot.lane.b32.xlu1 %v1736_v10, %s2072_s24  ;;  %v1037_v14 = vpop.f32.mrb[7].mxu0  ;;  %v1216_v10 = vrot.slane %v2182_v27, %v1215_v6 }
 0x992   : > { %1064 = vrot.lane.b32.xlu0 %v1037_v14, %s2072_s24 }
 0xa03   : > { %v1067_v28 = vpop.permute.xlu1 %1066 }
 0xa04   : > { %v1065_v34 = vpop.permute.xlu0 %1064  ;;  %v1076_v32 = vsel %vm1074_vm8, %v1073_v35, %v1067_v28  ;;  %v156_v28 = vld [vmem:[%s2312_s27 + $0x30] sm:$0xff] }
 0xa05   : > { %v1075_v36 = vsel %vm1074_vm8, %v1072_v31, %v1065_v34  ;;  %v1865_v31 = vpack.c.bf16 %v157_v29, %v156_v28  ;;  %v1221_v34 = vsub.s32 1, %v2121_v4 }
 0xa06   : > { %1745 = vmatprep.mubr.msk.f32.mxu0 %vm164_vm4, %v1075_v36 }
 0xa07   : > { %1746 = vmatmul.mubr.msk.f32.vlgmr.msra.gmra.mrb[8].mxu0 %vm164_vm4, %v1076_v32  ;;  %v1222_v35 = vrot.slane %v2182_v27, %v1221_v34 }
 0xa08   : > { %1856 = vmatpush3.bf16.msra.mxu0 %v1853_v0 }
 0xa09   : > { %1858 = vmatprep.subr.bf16.mxu0 %v1857_v20 }
 0xa0c   : > { %1860 = vmatpush3.bf16.msra.mxu0 %v1857_v20  ;;  %v1422_v20 = vsub.s32 5, %v2121_v4 }
 0xa0d   : > { %1862 = vmatprep.subr.bf16.mxu0 %v1861_v24 }
 0xa0e   : > { %v1423_v21 = vrot.slane %v2182_v27, %v1422_v20 }
 0xa10   : > { %1864 = vmatpush3.bf16.msra.mxu0 %v1861_v24 }
 0xa11   : > { %1866 = vmatprep.subr.bf16.mxu0 %v1865_v31 }
 0xa14   : > { %1868 = vmatpush3.bf16.msra.mxu0 %v1865_v31 }
 0xada   : > { %v1747_v56 = vpop.f32.mrb[8].mxu0 }
 0xadb   : > { %v1175_v38 = vadd.f32 %v1747_v56, %v1080_v30  ;;  %v1169_v39 = vpop.f32.mrb[9].mxu0 }
 0xadc   : > { %v1170_v40 = vadd.f32 %v1169_v39, %v1080_v30 }
 0xadd   : > { %v1179_v55 = vadd.f32 %v2047_v16, %v1175_v38 }
 0xade   : > { %v1178_v41 = vadd.f32 %v2051_v18, %v1170_v40  ;;  %v1308_v40 = vsub.s32 7, %v2121_v4  ;;  %v2075_v4 = vmov (%p131_p0), 0.0  }
 0xadf   : > { %v1183_v42 = vsel %vm164_vm4, %v1179_v55, 0.0 }
 0xae0   : > { %1184 = vadd.xlane.f32.xlu1 %v1183_v42  ;;  %v1180_v43 = vsel %vm164_vm4, %v1178_v41, 0.0 }
 0xae1   : > { %1181 = vadd.xlane.f32.xlu0 %v1180_v43 }
 0xb6d   : > { %v1185_v44 = vpop.xlane.xlu1 %1184 }
 0xb6e   : > { %v1188_v45 = vmul.f32 0.03125, %v1185_v44  ;;  %v1182_v46 = vpop.xlane.xlu0 %1181 }
 0xb6f   : > { %v1187_v47 = vmul.f32 0.03125, %v1182_v46 }
 0xb70   : > { %v1190_v48 = vsub.f32 %v1179_v55, %v1188_v45  ;;  %v1309_v55 = vrot.slane %v2182_v27, %v1308_v40 }
 0xb71   : > { %v1189_v49 = vsub.f32 %v1178_v41, %v1187_v47 }
 0xb72   : > { %v1192_v37 = vmul.f32 %v1190_v48, %v1190_v48 }
 0xb73   : > { %v1191_v16 = vmul.f32 %v1189_v49, %v1189_v49 }
 0xb74   : > { %v1196_v50 = vsel %vm164_vm4, %v1192_v37, 0.0 }
 0xb75   : > { %v1193_v18 = vsel %vm164_vm4, %v1191_v16, 0.0 }
 0xb76   : > { %1194 = vadd.xlane.f32.xlu0 %v1193_v18 }
 0xb7a   : > { %1197 = vadd.xlane.f32.xlu0 %v1196_v50 }
 0xc03   : > { %v1195_v1 = vpop.xlane.xlu0 %1194 }
 0xc04   : > { %v1199_v2 = vmul.f32 0.03125, %v1195_v1 }
 0xc06   : > { %v1201_v33 = vadd.f32 1e-05, %v1199_v2  ;;  %v1429_v2 = vrot.slane %v2182_v27, %v1428_v22  ;;  %v1440_v27 = vld [vmem:[%s2380_s5] sm:$0xff] (%p131_p0) }
 0xc07   : > { %v1198_v3 = vpop.xlane.xlu0 %1197 }
 0xc08   : > { %2001 = vrsqrt.f32 %v1201_v33  ;;  %v1200_v5 = vmul.f32 0.03125, %v1198_v3 }
 0xc0a   : > { %v1202_v57 = vadd.f32 1e-05, %v1200_v5 }
 0xc0c   : > { %2003 = vrsqrt.f32 %v1202_v57 }
 0xc12   : > { %v2002_v8 = vpop.eup %2001 }
 0xc13   : > { %v1205_v9 = vmul.f32 %v2002_v8, %v1189_v49  ;;  %v1442_v8 = vld [vmem:[%s2380_s5 + $0x10] sm:$0xff] (%p131_p0) }
 0xc15   : > { %v1211_v14 = vmul.f32 %v1210_v7, %v1205_v9  ;;  %v2073_v9 = vmov (%p131_p0), 0.0|0.0  }
 0xc16   : > { %v2004_v15 = vpop.eup %2003  ;;  %1869 = vmatprep.subr.bf16.mxu0 (%p131_p0), %v2073_v9 }
 0xc17   : > { %v1206_v17 = vmul.f32 %v2004_v15, %v1190_v48  ;;  %v1217_v23 = vadd.f32 %v1216_v10, %v1211_v14  ;;  %v1443_v14 = vld [vmem:[%s2380_s5 + $0x18] sm:$0xff] (%p131_p0) }
 0xc18   :  { %v1873_v11 = vpack.c.bf16 (%p131_p0), %v1443_v14, %v1442_v8 }
 0xc19   : > { %v1212_v25 = vmul.f32 %v1210_v7, %v1206_v17  ;;  %1756 = vmatprep.mubr.msk.f32.mxu1 %vm164_vm4, %v1217_v23  ;;  %v1441_v7 = vld [vmem:[%s2380_s5 + $0x8] sm:$0xff] (%p131_p0)  ;;  %v1594_v17 = vld [vmem:[%s2380_s5 + $0x20] ss:$0 sm:$0xff] (%p131_p0) }
 0xc1b   : > { %v1218_v26 = vadd.f32 %v1216_v10, %v1212_v25  ;;  %v1870_v10 = vpack.c.bf16 (%p131_p0), %v1441_v7, %v1440_v27 }
 0xc1d   : > { %1757 = vmatmul.mubr.msk.f32.vlgmr.msra.gmra.mrb[10].mxu1 %vm164_vm4, %v1218_v26 }
 0xcf0   : > { %v1758_v36 = vpop.f32.mrb[10].mxu1 }
 0xcf1   : > { %v1301_v32 = vadd.f32 %v1758_v36, %v1222_v35  ;;  %v1295_v30 = vpop.f32.mrb[11].mxu1 }
 0xcf2   : > { %v1296_v56 = vadd.f32 %v1295_v30, %v1222_v35 }
 0xcf3   : > { %v1305_v39 = vmax.f32 %v1301_v32, 0.0 }
 0xcf4   : > { %v1304_v38 = vmax.f32 %v1296_v56, 0.0 }
 0xcf6   : > { %1775 = vmatprep.mubr.msk.f32.mxu0 %vm1310_vm9, %v1304_v38 }
 0xcf7   : > { %1776 = vmatmul.mubr.msk.f32.vlgmr.msra.gmra.mrb[10].mxu0 %vm1310_vm9, %v1305_v39 }
 0xcf8   :  { %1786 = vmatprep.mubr.msk.f32.mxu0 (%p131_p0), %vm2074_vm10, %v2075_v4  ;;  %1871 = vmatpush3.bf16.msra.mxu0 (%p131_p0), %v1870_v10 }
 0xcf9   :  { %1872 = vmatprep.subr.bf16.mxu0 (%p131_p0), %v2073_v9 }
 0xcfc   :  { %1874 = vmatpush3.bf16.msra.mxu0 (%p131_p0), %v1873_v11 }
 0xdca   : > { %v1777_v41 = vpop.f32.mrb[10].mxu0 }
 0xdcb   : > { %v1389_v42 = vadd.f32 %v1777_v41, %v1309_v55  ;;  %v1383_v43 = vpop.f32.mrb[11].mxu0 }
 0xdcc   : > { %v1384_v44 = vadd.f32 %v1383_v43, %v1309_v55 }
 0xdcd   : > { %v1393_v45 = vadd.f32 %v1389_v42, %v1218_v26 }
 0xdce   : > { %v1392_v46 = vadd.f32 %v1384_v44, %v1217_v23 }
 0xdcf   : > { %v1397_v47 = vsel %vm164_vm4, %v1393_v45, 0.0 }
 0xdd0   : > { %1398 = vadd.xlane.f32.xlu0 %v1397_v47  ;;  %v1394_v48 = vsel %vm164_vm4, %v1392_v46, 0.0 }
 0xdd1   : > { %1395 = vadd.xlane.f32.xlu1 %v1394_v48 }
 0xe5d   : > { %v1399_v49 = vpop.xlane.xlu0 %1398 }
 0xe5e   : > { %v1401_v16 = vmul.f32 0.03125, %v1399_v49  ;;  %v1396_v18 = vpop.xlane.xlu1 %1395 }
 0xe5f   : > { %v1400_v37 = vmul.f32 0.03125, %v1396_v18 }
 0xe60   : > { %v1403_v50 = vsub.f32 %v1393_v45, %v1401_v16 }
 0xe61   : > { %v1402_v51 = vsub.f32 %v1392_v46, %v1400_v37 }
 0xe62   : > { %v1405_v52 = vmul.f32 %v1403_v50, %v1403_v50 }
 0xe63   : > { %v1404_v53 = vmul.f32 %v1402_v51, %v1402_v51 }
 0xe64   : > { %v1409_v54 = vsel %vm164_vm4, %v1405_v52, 0.0 }
 0xe65   : > { %1410 = vadd.xlane.f32.xlu0 %v1409_v54  ;;  %v1406_v59 = vsel %vm164_vm4, %v1404_v53, 0.0 }
 0xe66   : > { %1407 = vadd.xlane.f32.xlu1 %v1406_v59 }
 0xef2   : > { %v1411_v60 = vpop.xlane.xlu0 %1410 }
 0xef3   : > { %v1413_v61 = vmul.f32 0.03125, %v1411_v60  ;;  %v1408_v62 = vpop.xlane.xlu1 %1407 }
 0xef4   : > { %v1412_v63 = vmul.f32 0.03125, %v1408_v62 }
 0xef5   : > { %v1415_v0 = vadd.f32 1e-05, %v1413_v61 }
 0xef6   : > { %v1414_v19 = vadd.f32 1e-05, %v1412_v63 }
 0xef7   : > { %2005 = vrsqrt.f32 %v1415_v0 }
 0xef8   : > { %2007 = vrsqrt.f32 %v1414_v19 }
 0xf01   : > { %v2006_v24 = vpop.eup %2005 }
 0xf02   : > { %v2008_v1 = vpop.eup %2007  ;;  %v1419_v33 = vmul.f32 %v2006_v24, %v1403_v50 }
 0xf03   : > { %v1418_v3 = vmul.f32 %v2008_v1, %v1402_v51  ;;  %133 = sbr.rel (!%p131_p0) target bundleno = 218 (0xda), region = 54 }
 0xf04   : > { %v1425_v5 = vmul.f32 %v1423_v21, %v1419_v33 }
 0xf05   : > { %v1424_v57 = vmul.f32 %v1423_v21, %v1418_v3 }
 0xf06   : > { %v1431_v58 = vadd.f32 %v1429_v2, %v1425_v5  }
 0xf07   : > { %v1430_v6 = vadd.f32 %v1429_v2, %v1424_v57  }
 0xf08   : > { %v2384_v16 = vmov %v1431_v58  ;;  %v1436_v13 = vrot.slane (%p131_p0), %v1431_v58, 6 }
 0xf09   : > { %v2385_v18 = vmov %v1430_v6  ;;  %v1433_v12 = vrot.slane (%p131_p0), %v1430_v6, 7 }
 0xf0b   :  { %v1439_v15 = vsel %vm1438_vm11, %v1433_v12, %v1436_v13 }
 0xf0c   :  { %1787 = vmatmul.mubr.msk.f32.vlgmr.msra.gmra.mrb[0].mxu0 %vm164_vm4, %v1439_v15 }
 0xfdf   :  { %v1519_v23 = vpop.f32.mrb[0].mxu0 }
 0xfe0   :  { %v1520_v25 = vadd.f32 %v1594_v17, %v1519_v23  ;;  %v1788_v26 = vpop.f32.mrb[1].mxu0 }
 0xfe2   :  { %1524 = vst.msk [vmem:[#allocation2] sm:$0x3] %vm1523_vm12, %v1520_v25 }
 0xfe3   :  { %2020 = shalt.err (!%p2017_p5)
}
 0xfe4   :  { %s2021_s14 = scalar_lea.hbm %s2381_s6, 32 }
 0xfe5   :  { %p2022_p6 = scmp.ne.s32.totalorder %s2381_s6, %s2021_s14  ;;  %p2025_p7 = scmp.lt.u32.totalorder %s2021_s14, %s2381_s6 }
 0xfe7   :  { %p2027_p8 = pnand %p2025_p7, %p2022_p6 }
 0xfe9   :  { %2030 = shalt.err (!%p2027_p8)
}
 0xfea   :  { %1534 = dma.vmem_to_hbm [thread:$0]  %s1532_s0, 32, %s2381_s6, [#allocation3]  }
 0xfeb   :  { %2043 = dma.done.wait [#allocation3], 32  }
 0xfec   :  { %2044 = vsyncadd [#allocation3], 4294967264 }
 0xfed   :  { %1538 = vsyncpa [#allocation3], 1 }

</bundles_post_ra>
